<compile_context>
chip_gen: v6e
topology: v6e:2x2x1
jax: 0.10.0
libtpu: 0.0.40
codegen_flags: <defaults>
</compile_context>

<pallas_src>
import functools

import jax
import jax.numpy as jnp
from jax.experimental import pallas as pl
from jax.experimental.pallas import tpu as pltpu

LN_EPS = 1e-5  # torch.nn.LayerNorm default


def _round_up(x, m):
    return (x + m - 1) // m * m


# -----------------------------------------------------------------------------
# Kernel
# -----------------------------------------------------------------------------
def _mlp_head_kernel(x_ref, w1_ref, vec_ref, w2_ref, out_ref, *acc,
                     hidden, h_pad, out_pad, num_k):
    # x_ref:   (TILE_N, TILE_K)   input dtype (cast to bf16 here)
    # w1_ref:  (TILE_K, H_pad)    bf16  (zero rows beyond input_size, zero cols beyond hidden)
    # vec_ref: (8, P) f32 -- row 0: b1, 1: gamma, 2: beta, 3: b2 (padded lanes are 0)
    # w2_ref:  (H_pad, OUT_pad)   bf16
    # out_ref: (TILE_N, OUT_pad)  lane-dense output (padded cols sliced off by wrapper)
    # acc:     optional (TILE_N, H_pad) f32 scratch, only present when num_k > 1
    part = jnp.dot(x_ref[...].astype(jnp.bfloat16), w1_ref[...],
                   preferred_element_type=jnp.float32)

    def epilogue(pre_act):
        b1 = vec_ref[0:1, 0:h_pad]
        gamma = vec_ref[1:2, 0:h_pad]
        beta = vec_ref[2:3, 0:h_pad]
        b2 = vec_ref[3:4, 0:out_pad]

        h = jnp.tanh(pre_act + b1)               # padded hidden lanes stay exactly 0

        # LayerNorm over the true hidden width.  Padded lanes are 0, so the sums
        # need no mask; one-pass variance (tanh-bounded -> mild cancellation).
        inv_h = 1.0 / float(hidden)
        mean = jnp.sum(h, axis=-1, keepdims=True) * inv_h
        ex2 = jnp.sum(h * h, axis=-1, keepdims=True) * inv_h
        var = jnp.maximum(ex2 - mean * mean, 0.0)
        hn = (h - mean) * jax.lax.rsqrt(var + LN_EPS) * gamma + beta
        # padded lanes: gamma = beta = 0 -> hn = 0 (and w2's padded rows are 0 too).

        # Dropout: identity in eval mode.

        logits = jnp.dot(hn.astype(jnp.bfloat16), w2_ref[...],
                         preferred_element_type=jnp.float32) + b2
        out_ref[...] = logits.astype(out_ref.dtype)

    if num_k == 1:
        # Resident-weight fast path: no scratch accumulator round-trip.
        epilogue(part)
    else:
        k = pl.program_id(1)
        acc_ref = acc[0]

        @pl.when(k == 0)
        def _init():
            acc_ref[...] = jnp.zeros_like(acc_ref)

        acc_ref[...] += part

        @pl.when(k == num_k - 1)
        def _finalize():
            epilogue(acc_ref[...])


# -----------------------------------------------------------------------------
# One-time parameter preparation (hoisted out of the per-call forward)
# -----------------------------------------------------------------------------
def prepare_params(params, *, max_resident_weight_bytes=16 * 1024 * 1024):
    """Pad / cast / fuse the head parameters once (call at parameter-load time)."""
    w1, b1, gamma, beta, w2, b2 = params
    input_size, hidden = w1.shape
    output_size = w2.shape[1]

    h_pad = _round_up(hidden, 128)
    out_pad = _round_up(output_size, 128)
    in128 = _round_up(input_size, 128)

    # VMEM-residency decision (conservative for v7x's 64 MiB/TC: assume the
    # pipeliner may double-buffer even constant-index weight blocks).
    w_bytes = (in128 * h_pad + h_pad * out_pad) * 2       # bf16
    if w_bytes <= max_resident_weight_bytes:
        tile_k = in128                                     # single K step, w1 resident
        in_total = in128
    else:
        # K-tiled fallback: stream w1 in (tile_k, h_pad) slabs.
        tile_k = 128
        for cand in (512, 256):
            if input_size > cand and cand * h_pad * 2 * 2 <= 8 * 1024 * 1024:
                tile_k = cand
                break
        in_total = _round_up(input_size, tile_k)

    w1p = jnp.zeros((in_total, h_pad), jnp.bfloat16)
    w1p = w1p.at[:input_size, :hidden].set(w1.astype(jnp.bfloat16))
    w2p = jnp.zeros((h_pad, out_pad), jnp.bfloat16)
    w2p = w2p.at[:hidden, :output_size].set(w2.astype(jnp.bfloat16))

    # Fuse the four small vectors into one (8, P) f32 block -> single small DMA.
    p = max(h_pad, out_pad)
    vec = jnp.zeros((8, p), jnp.float32)
    vec = vec.at[0, :hidden].set(b1.astype(jnp.float32))
    vec = vec.at[1, :hidden].set(gamma.astype(jnp.float32))
    vec = vec.at[2, :hidden].set(beta.astype(jnp.float32))
    vec = vec.at[3, :output_size].set(b2.astype(jnp.float32))

    return dict(
        w1p=w1p, w2p=w2p, vec=vec,
        input_size=input_size, hidden=hidden, output_size=output_size,
        in_total=in_total, tile_k=tile_k, h_pad=h_pad, out_pad=out_pad, p=p,
    )


def _pick_tile_n(n, tile_k, h_pad, out_pad, x_bytes, out_bytes):
    # Per-row VMEM: double-buffered x tile + double-buffered out tile + f32 acc.
    per_row = 2 * tile_k * x_bytes + 2 * out_pad * out_bytes + h_pad * 4
    budget = 24 * 1024 * 1024          # leaves headroom for weights on v7x (64 MiB/TC)
    for t in (1024, 512, 256, 128):
        if t * per_row <= budget and n >= 2 * t:   # >=2 row tiles -> v7x dual-TC sharding
            return t
    if n >= 128:
        return 128
    return max(16, _round_up(n, 16))   # multiple of 16 for small N


# -----------------------------------------------------------------------------
# Forward
# -----------------------------------------------------------------------------
def _xla_forward(x, prep, out_dtype):
    """Plain fused-XLA path for tiny N (same padded-weight math as the kernel)."""
    in_total, input_size = prep["in_total"], prep["input_size"]
    if in_total != input_size:
        x = jnp.pad(x, ((0, 0), (0, in_total - input_size)))
    h_pad, out_pad, vec = prep["h_pad"], prep["out_pad"], prep["vec"]
    h = jnp.dot(x.astype(jnp.bfloat16), prep["w1p"],
                preferred_element_type=jnp.float32) + vec[0:1, :h_pad]
    h = jnp.tanh(h)
    inv_h = 1.0 / float(prep["hidden"])
    mean = jnp.sum(h, -1, keepdims=True) * inv_h
    ex2 = jnp.sum(h * h, -1, keepdims=True) * inv_h
    var = jnp.maximum(ex2 - mean * mean, 0.0)
    hn = (h - mean) * jax.lax.rsqrt(var + LN_EPS) * vec[1:2, :h_pad] + vec[2:3, :h_pad]
    logits = jnp.dot(hn.astype(jnp.bfloat16), prep["w2p"],
                     preferred_element_type=jnp.float32) + vec[3:4, :out_pad]
    return logits[:, :prep["output_size"]].astype(out_dtype)


def adjective_probing_head_forward(inputs, prepared, *, force_pallas=False,
                                   min_pallas_rows=256, out_dtype=jnp.float32):
    """inputs: [..., input_size]; returns logits [N, output_size], N = prod(leading dims)."""
    input_size = prepared["input_size"]
    output_size = prepared["output_size"]
    in_total = prepared["in_total"]
    tile_k = prepared["tile_k"]
    h_pad = prepared["h_pad"]
    out_pad = prepared["out_pad"]
    p = prepared["p"]
    hidden = prepared["hidden"]

    x = inputs.reshape(-1, input_size)          # inputs.view(-1, inputs.size(-1))
    n = x.shape[0]

    # Tiny-N: a single small grid step cannot amortize the pallas_call fixed cost.
    if n < min_pallas_rows and not force_pallas:
        return _xla_forward(x, prepared, out_dtype)

    # Feature padding only when required (unaligned input_size / K tiling).
    if in_total != input_size:
        x = jnp.pad(x, ((0, 0), (0, in_total - input_size)))

    x_bytes = jnp.dtype(x.dtype).itemsize
    out_bytes = jnp.dtype(out_dtype).itemsize
    tile_n = _pick_tile_n(n, tile_k, h_pad, out_pad, x_bytes, out_bytes)
    num_k = in_total // tile_k
    grid = (pl.cdiv(n, tile_n), num_k)          # partial last row tile handled by Pallas

    kernel = functools.partial(_mlp_head_kernel, hidden=hidden, h_pad=h_pad,
                               out_pad=out_pad, num_k=num_k)

    scratch_shapes = []
    if num_k > 1:
        scratch_shapes = [pltpu.VMEM((tile_n, h_pad), jnp.float32)]

    cost = pl.CostEstimate(
        flops=2 * n * (in_total * h_pad + h_pad * out_pad),
        transcendentals=n * h_pad,              # tanh
        bytes_accessed=(x.size * x_bytes
                        + prepared["w1p"].size * 2 + prepared["w2p"].size * 2
                        + prepared["vec"].size * 4
                        + n * out_pad * out_bytes),
    )

    # VMEM limit derived from actual buffers (assume 2x buffering) + headroom.
    vmem_bytes = (2 * tile_n * tile_k * x_bytes
                  + 2 * tile_n * out_pad * out_bytes
                  + 2 * tile_k * h_pad * 2
                  + 2 * h_pad * out_pad * 2
                  + 2 * 8 * p * 4
                  + (tile_n * h_pad * 4 if num_k > 1 else 0)
                  + 4 * 1024 * 1024)
    vmem_bytes = int(min(max(vmem_bytes, 16 * 1024 * 1024), 100 * 1024 * 1024))

    out = pl.pallas_call(
        kernel,
        out_shape=jax.ShapeDtypeStruct((n, out_pad), out_dtype),
        grid_spec=pltpu.PrefetchScalarGridSpec(
            num_scalar_prefetch=0,
            grid=grid,
            in_specs=[
                pl.BlockSpec((tile_n, tile_k), lambda i, k: (i, k)),   # x: streamed
                pl.BlockSpec((tile_k, h_pad), lambda i, k: (k, 0)),    # w1 slab / resident
                pl.BlockSpec((8, p), lambda i, k: (0, 0)),             # b1/gamma/beta/b2
                pl.BlockSpec((h_pad, out_pad), lambda i, k: (0, 0)),   # w2: resident
            ],
            out_specs=pl.BlockSpec((tile_n, out_pad), lambda i, k: (i, 0)),
            scratch_shapes=scratch_shapes,
        ),
        compiler_params=pltpu.CompilerParams(
            dimension_semantics=("parallel", "arbitrary"),
            vmem_limit_bytes=vmem_bytes,
        ),
        cost_estimate=cost,
    )(x, prepared["w1p"], prepared["vec"], prepared["w2p"])

    # Slice off lane padding: logits.view(-1, output_size).
    return out[:, :output_size]


# -----------------------------------------------------------------------------
# Synthetic params / reference
# -----------------------------------------------------------------------------
def init_params(key, input_size, hidden_size, output_size):
    """Deterministic synthetic parameters matching the module's __init__ shapes."""
    k1, k2, k3, k4 = jax.random.split(key, 4)
    w1 = jax.random.normal(k1, (input_size, hidden_size), jnp.float32) * 0.05
    b1 = jax.random.normal(k2, (hidden_size,), jnp.float32) * 0.05
    gamma = jnp.ones((hidden_size,), jnp.float32)   # LayerNorm weight init
    beta = jnp.zeros((hidden_size,), jnp.float32)   # LayerNorm bias init
    w2 = jax.random.normal(k3, (hidden_size, output_size), jnp.float32) * 0.05
    b2 = jax.random.normal(k4, (output_size,), jnp.float32) * 0.05
    return (w1, b1, gamma, beta, w2, b2)


def _reference_forward(inputs, params):
    """Plain-JAX reference mirroring the kernel's bf16-matmul / f32-epilogue math."""
    w1, b1, gamma, beta, w2, b2 = params
    x = inputs.reshape(-1, inputs.shape[-1]).astype(jnp.bfloat16)
    h = jnp.dot(x, w1.astype(jnp.bfloat16), preferred_element_type=jnp.float32) + b1
    h = jnp.tanh(h)
    mu = h.mean(-1, keepdims=True)
    var = ((h - mu) ** 2).mean(-1, keepdims=True)
    h = (h - mu) * jax.lax.rsqrt(var + LN_EPS) * gamma + beta
    return jnp.dot(h.astype(jnp.bfloat16), w2.astype(jnp.bfloat16),
                   preferred_element_type=jnp.float32) + b2


if __name__ == "__main__":
    key = jax.random.PRNGKey(0)

    # --- Test 1: module-like small shapes (unaligned dims), resident-weight path. ---
    batch, seq = 2, 8
    input_size, hidden_size, output_size = 96, 48, 7
    k_in, k_p, key = jax.random.split(key, 3)
    inputs = jax.random.normal(k_in, (batch, seq, input_size), jnp.float32)
    params = init_params(k_p, input_size, hidden_size, output_size)
    prepared = prepare_params(params)

    logits = adjective_probing_head_forward(inputs, prepared, force_pallas=True)
    logits = jax.block_until_ready(logits)
    ref = _reference_forward(inputs, params)
    assert logits.shape == (batch * seq, output_size)
    assert jnp.allclose(logits, ref, atol=2e-2, rtol=2e-2), (
        float(jnp.max(jnp.abs(logits - ref))))

    # Tiny-N XLA fallback path must agree as well.
    logits_xla = adjective_probing_head_forward(inputs, prepared)   # n=16 -> fallback
    logits_xla = jax.block_until_ready(logits_xla)
    assert jnp.allclose(logits_xla, ref, atol=2e-2, rtol=2e-2)

    # --- Test 2: forced K-tiled path, aligned input, partial row tiles. ---
    n2, in2, hid2, out2 = 300, 256, 112, 10
    k_in2, k_p2, key = jax.random.split(key, 3)
    inputs2 = jax.random.normal(k_in2, (n2, in2), jnp.float32)
    params2 = init_params(k_p2, in2, hid2, out2)
    prepared2 = prepare_params(params2, max_resident_weight_bytes=0)  # force K tiling
    logits2 = adjective_probing_head_forward(inputs2, prepared2, force_pallas=True)
    logits2 = jax.block_until_ready(logits2)
    ref2 = _reference_forward(inputs2, params2)
    assert logits2.shape == (n2, out2)
    assert jnp.allclose(logits2, ref2, atol=2e-2, rtol=2e-2), (
        float(jnp.max(jnp.abs(logits2 - ref2))))

    print("KERNEL_OK")
</pallas_src>

<mosaic_0001>
module attributes {stable_mosaic.version = 11 : i64} {
  func.func @_mlp_head_kernel(%arg0: i32, %arg1: i32, %arg2: memref<16x128xf32, #tpu.memory_space<vmem>>, %arg3: memref<128x128xbf16, #tpu.memory_space<vmem>>, %arg4: memref<8x128xf32, #tpu.memory_space<vmem>>, %arg5: memref<128x128xbf16, #tpu.memory_space<vmem>>, %arg6: memref<16x128xf32, #tpu.memory_space<vmem>>) attributes {dimension_semantics = [#tpu.dimension_semantics<parallel>, #tpu.dimension_semantics<arbitrary>], iteration_bounds = array<i64: 1, 1>, scalar_prefetch = 0 : i64, scratch_operands = 0 : i64, tpu.core_type = #tpu.core_type<tc>, window_params = [{transform_indices = @transform_0, window_bounds = array<i64: 16, 128>}, {transform_indices = @transform_1, window_bounds = array<i64: 128, 128>}, {pipeline_mode = #tpu.pipeline_mode<synchronous>, transform_indices = @transform_2, window_bounds = array<i64: 8, 128>}, {pipeline_mode = #tpu.pipeline_mode<synchronous>, transform_indices = @transform_3, window_bounds = array<i64: 128, 128>}, {transform_indices = @transform_4, window_bounds = array<i64: 16, 128>}]} {
    %c0 = arith.constant 0 : index
    %c0_0 = arith.constant 0 : index
    %0 = vector.load %arg2[%c0, %c0_0] : memref<16x128xf32, #tpu.memory_space<vmem>>, vector<16x128xf32>
    %1 = arith.truncf %0 : vector<16x128xf32> to vector<16x128xbf16>
    %c0_1 = arith.constant 0 : index
    %c0_2 = arith.constant 0 : index
    %2 = vector.load %arg3[%c0_1, %c0_2] : memref<128x128xbf16, #tpu.memory_space<vmem>>, vector<128x128xbf16>
    %cst = arith.constant dense<0.000000e+00> : vector<16x128xf32>
    %3 = tpu.matmul %1, %2, %cst {dimension_numbers = #tpu.dot_dimension_numbers<[1], [0], [0], [1], [0, 0, 1, 1], [], []>} : vector<16x128xbf16>, vector<128x128xbf16>, vector<16x128xf32> -> vector<16x128xf32>
    %c0_3 = arith.constant 0 : index
    %c0_4 = arith.constant 0 : index
    %4 = vector.load %arg4[%c0_3, %c0_4] : memref<8x128xf32, #tpu.memory_space<vmem>>, vector<1x128xf32>
    %c1 = arith.constant 1 : index
    %c0_5 = arith.constant 0 : index
    %5 = vector.load %arg4[%c1, %c0_5] : memref<8x128xf32, #tpu.memory_space<vmem>>, vector<1x128xf32>
    %c2 = arith.constant 2 : index
    %c0_6 = arith.constant 0 : index
    %6 = vector.load %arg4[%c2, %c0_6] : memref<8x128xf32, #tpu.memory_space<vmem>>, vector<1x128xf32>
    %c3 = arith.constant 3 : index
    %c0_7 = arith.constant 0 : index
    %7 = vector.load %arg4[%c3, %c0_7] : memref<8x128xf32, #tpu.memory_space<vmem>>, vector<1x128xf32>
    %8 = vector.broadcast %4 : vector<1x128xf32> to vector<16x128xf32>
    %9 = arith.addf %3, %8 : vector<16x128xf32>
    %10 = math.tanh %9 : vector<16x128xf32>
    %cst_8 = arith.constant dense<0.000000e+00> : vector<16xf32>
    %11 = vector.multi_reduction <add>, %10, %cst_8 [1] : vector<16x128xf32> to vector<16xf32>
    %12 = vector.shape_cast %11 : vector<16xf32> to vector<16x1xf32>
    %cst_9 = arith.constant 0.020833334 : f32
    %13 = vector.broadcast %cst_9 : f32 to vector<16x1xf32>
    %14 = arith.mulf %12, %13 : vector<16x1xf32>
    %15 = arith.mulf %10, %10 : vector<16x128xf32>
    %cst_10 = arith.constant dense<0.000000e+00> : vector<16xf32>
    %16 = vector.multi_reduction <add>, %15, %cst_10 [1] : vector<16x128xf32> to vector<16xf32>
    %17 = vector.shape_cast %16 : vector<16xf32> to vector<16x1xf32>
    %cst_11 = arith.constant 0.020833334 : f32
    %18 = vector.broadcast %cst_11 : f32 to vector<16x1xf32>
    %19 = arith.mulf %17, %18 : vector<16x1xf32>
    %20 = arith.mulf %14, %14 : vector<16x1xf32>
    %21 = arith.subf %19, %20 : vector<16x1xf32>
    %cst_12 = arith.constant 0.000000e+00 : f32
    %22 = vector.broadcast %cst_12 : f32 to vector<16x1xf32>
    %23 = arith.maximumf %21, %22 : vector<16x1xf32>
    %24 = vector.broadcast %14 : vector<16x1xf32> to vector<16x128xf32>
    %25 = arith.subf %10, %24 : vector<16x128xf32>
    %cst_13 = arith.constant 9.99999974E-6 : f32
    %26 = vector.broadcast %cst_13 : f32 to vector<16x1xf32>
    %27 = arith.addf %23, %26 : vector<16x1xf32>
    %28 = math.rsqrt %27 : vector<16x1xf32>
    %29 = vector.broadcast %28 : vector<16x1xf32> to vector<16x128xf32>
    %30 = arith.mulf %25, %29 : vector<16x128xf32>
    %31 = vector.broadcast %5 : vector<1x128xf32> to vector<16x128xf32>
    %32 = arith.mulf %30, %31 : vector<16x128xf32>
    %33 = vector.broadcast %6 : vector<1x128xf32> to vector<16x128xf32>
    %34 = arith.addf %32, %33 : vector<16x128xf32>
    %35 = arith.truncf %34 : vector<16x128xf32> to vector<16x128xbf16>
    %c0_14 = arith.constant 0 : index
    %c0_15 = arith.constant 0 : index
    %36 = vector.load %arg5[%c0_14, %c0_15] : memref<128x128xbf16, #tpu.memory_space<vmem>>, vector<128x128xbf16>
    %cst_16 = arith.constant dense<0.000000e+00> : vector<16x128xf32>
    %37 = tpu.matmul %35, %36, %cst_16 {dimension_numbers = #tpu.dot_dimension_numbers<[1], [0], [0], [1], [0, 0, 1, 1], [], []>} : vector<16x128xbf16>, vector<128x128xbf16>, vector<16x128xf32> -> vector<16x128xf32>
    %38 = vector.broadcast %7 : vector<1x128xf32> to vector<16x128xf32>
    %39 = arith.addf %37, %38 : vector<16x128xf32>
    %c0_17 = arith.constant 0 : index
    %c0_18 = arith.constant 0 : index
    %40 = vector.load %arg6[%c0_17, %c0_18] : memref<16x128xf32, #tpu.memory_space<vmem>>, vector<16x128xf32>
    tpu.vector_store %arg6[%c0_17, %c0_18], %39 {strides = array<i32>} : memref<16x128xf32, #tpu.memory_space<vmem>>, vector<16x128xf32>,
    return
  }
  func.func @transform_0(%arg0: i32, %arg1: i32) -> (i32, i32) {
    %c0_i32 = arith.constant 0 : i32
    return %arg0, %arg1 : i32, i32
  }
  func.func @transform_1(%arg0: i32, %arg1: i32) -> (i32, i32) {
    %c0_i32 = arith.constant 0 : i32
    %c0_i32_0 = arith.constant 0 : i32
    return %arg1, %c0_i32 : i32, i32
  }
  func.func @transform_2(%arg0: i32, %arg1: i32) -> (i32, i32) {
    %c0_i32 = arith.constant 0 : i32
    %c0_i32_0 = arith.constant 0 : i32
    %c0_i32_1 = arith.constant 0 : i32
    return %c0_i32, %c0_i32_0 : i32, i32
  }
  func.func @transform_3(%arg0: i32, %arg1: i32) -> (i32, i32) {
    %c0_i32 = arith.constant 0 : i32
    %c0_i32_0 = arith.constant 0 : i32
    %c0_i32_1 = arith.constant 0 : i32
    return %c0_i32, %c0_i32_0 : i32, i32
  }
  func.func @transform_4(%arg0: i32, %arg1: i32) -> (i32, i32) {
    %c0_i32 = arith.constant 0 : i32
    %c0_i32_0 = arith.constant 0 : i32
    return %arg0, %c0_i32 : i32, i32
  }
}

</mosaic_0001>

<bundles_post_ra>
// kernel: tpu_custom_call.1
= control target key start
LH: loop header
LB: loop body
LE: loop exit
PB: predicated region body
PF: predicated region fallthrough
CT: control target
= control target key end

     0   :  { %9 = vsyncpa [#allocation3], 0  ;;  %s663_s0 = inlined_call_operand.hbm [shape: f32[16,128], index: 0, kind: input, shape index: {}]   ;;  %s664_s1 = inlined_call_operand.hbm [shape: bf16[128,128], index: 1, kind: input, shape index: {}]   ;;  %s665_s2 = inlined_call_operand.hbm [shape: f32[8,128], index: 2, kind: input, shape index: {}]   ;;  %s666_s3 = inlined_call_operand.hbm [shape: bf16[128,128], index: 3, kind: input, shape index: {}]   ;;  %s667_s4 = inlined_call_operand.hbm [shape: f32[16,128], index: 4, kind: output, shape index: {}]  }
   0x1   :  { %10 = vsyncpa [#allocation6], 0 }
   0x2   :  { %11 = vsyncpa [#allocation9], 0 }
   0x3   :  { %12 = vsyncpa [#allocation4], 0  ;;  %s582_s15 = smov [#allocation5]  }
   0x4   :  { %s30_s16 = sshll.u32 %s582_s15, 4  ;;  %s31_s16 = int_to_ptr.vmem [resolvable:$true] %s30_s16 }
   0x5   :  { %s482_s17 = scalar_lea.vmem %s31_s16, 1024  ;;  %p487_p1 = scmp.lt.s32.totalorder %s31_s16, %s31_s16 }
   0x6   :  { %p483_p0 = scmp.ne.s32.totalorder %s31_s16, %s482_s17  ;;  %p488_p2 = scmp.lt.s32.totalorder %s482_s17, %s482_s17 }
   0x8   :  { %p489_p3 = por %p488_p2, %p487_p1 }
   0xa   :  { %p490_p4 = pnand %p489_p3, %p483_p0 }
   0xc   :  { %493 = shalt.err (!%p490_p4)
}
   0xd   :  { %s583_s18 = smov 64   ;;  %s584_s19 = smov 4  }
   0xe   :  { %36 = dma.hbm_to_vmem [thread:$0]  %s664_s1, 1024, %s31_s16, [#allocation6], %s583_s18, %s583_s18, %s584_s19  }
   0xf   :  { %s585_s22 = smov [#allocation2]  }
  0x10   :  { %s18_s23 = sshll.u32 %s585_s22, 4  ;;  %s19_s23 = int_to_ptr.vmem [resolvable:$true] %s18_s23 }
  0x11   :  { %s502_s24 = scalar_lea.vmem %s19_s23, 256  ;;  %p507_p6 = scmp.lt.s32.totalorder %s19_s23, %s19_s23 }
  0x12   :  { %p503_p5 = scmp.ne.s32.totalorder %s19_s23, %s502_s24  ;;  %p508_p7 = scmp.lt.s32.totalorder %s502_s24, %s502_s24 }
  0x14   :  { %p509_p8 = por %p508_p7, %p507_p6 }
  0x16   :  { %p510_p9 = pnand %p509_p8, %p503_p5 }
  0x18   :  { %513 = shalt.err (!%p510_p9)
}
  0x19   :  { %s586_s25 = smov 128   ;;  %s587_s26 = smov 8  }
  0x1a   :  { %24 = dma.hbm_to_vmem [thread:$0]  %s663_s0, 256, %s19_s23, [#allocation3], %s586_s25, %s586_s25, %s587_s26  }
  0x1b   :  { %s588_s1 = smov [#allocation7]   ;;  %s589_s30 = smov [#allocation8]  }
  0x1c   :  { %s43_s29 = sshll.u32 %s588_s1, 4  ;;  %s52_s5 = sshll.u32 %s589_s30, 4  ;;  %s44_s29 = int_to_ptr.vmem [resolvable:$true] %s43_s29  ;;  %s53_s5 = int_to_ptr.vmem [resolvable:$true] %s52_s5 }
  0x1d   :  { %s522_s6 = scalar_lea.vmem %s44_s29, 128  ;;  %p527_p11 = scmp.lt.s32.totalorder %s44_s29, %s44_s29 }
  0x1e   :  { %p523_p10 = scmp.ne.s32.totalorder %s44_s29, %s522_s6  ;;  %p528_p12 = scmp.lt.s32.totalorder %s522_s6, %s522_s6 }
  0x20   :  { %p529_p13 = por %p528_p12, %p527_p11 }
  0x22   :  { %p530_p0 = pnand %p529_p13, %p523_p10 }
  0x24   :  { %533 = shalt.err (!%p530_p0)
}
  0x25   :  { %46 = dma.hbm_to_vmem [thread:$0]  %s665_s2, 128, %s44_s29, [#allocation6]  }
  0x26   :  { %s542_s9 = scalar_lea.vmem %s53_s5, 1024  ;;  %p547_p2 = scmp.lt.s32.totalorder %s53_s5, %s53_s5 }
  0x27   :  { %p543_p1 = scmp.ne.s32.totalorder %s53_s5, %s542_s9  ;;  %p548_p3 = scmp.lt.s32.totalorder %s542_s9, %s542_s9 }
  0x29   :  { %p549_p4 = por %p548_p3, %p547_p2 }
  0x2b   :  { %p550_p5 = pnand %p549_p4, %p543_p1 }
  0x2d   :  { %553 = shalt.err (!%p550_p5)
}
  0x2e   :  { %58 = dma.hbm_to_vmem [thread:$0]  %s666_s3, 1024, %s53_s5, [#allocation9], %s583_s18, %s583_s18, %s584_s19  }
  0x2f   :  { %574 = dma.done.wait [#allocation3], 256  }
  0x30   :  { %575 = vsyncadd [#allocation3], 4294967040 }
  0x31   :  { %576 = dma.done.wait [#allocation6], 1152  }
  0x32   :  { %577 = vsyncadd [#allocation6], 4294966144 }
  0x33   :  { %578 = dma.done.wait [#allocation9], 1024  }
  0x34   :  { %579 = vsyncadd [#allocation9], 4294966272  ;;  %v590_v0 = vmov 0.0   ;;  %vm591_vm0 = vmmov 0   ;;  %v450_v1 = vld [vmem:[#allocation5 + $0x38] sm:$0xff]   ;;  %v451_v2 = vld [vmem:[#allocation5 + $0x30] sm:$0xff]  }
  0x35   :  { %399 = vmatprep.subr.bf16.mxu0 %v590_v0  ;;  %415 = vmatprep.mubr.msk.bf16.mxu0 %vm591_vm0, %v590_v0  ;;  %v452_v3 = vld [vmem:[#allocation5 + $0x28] sm:$0xff]   ;;  %v453_v4 = vld [vmem:[#allocation5 + $0x20] sm:$0xff]   ;;  %v454_v5 = vld [vmem:[#allocation5 + $0x18] sm:$0xff]   ;;  %s592_s2 = smov [#allocation10]  }
  0x36   :  { %419 = vmatprep.subr.bf16.mxu1 %v590_v0  ;;  %435 = vmatprep.mubr.msk.bf16.mxu1 %vm591_vm0, %v590_v0  ;;  %v455_v6 = vld [vmem:[#allocation5 + $0x10] sm:$0xff]   ;;  %v456_v7 = vld [vmem:[#allocation5 + $0x8] sm:$0xff]   ;;  %v457_v8 = vld [vmem:[#allocation5] sm:$0xff]   ;;  %s347_s3 = sshll.u32 %s592_s2, 4  ;;  %s348_s3 = int_to_ptr.vmem [resolvable:$true] %s347_s3 }
  0x37   :  { %400 = vmatpush3.bf16.msra.mxu0 %v450_v1  ;;  %v72_v9 = vld [vmem:[#allocation2] sm:$0xff]  ;;  %v73_v10 = vld [vmem:[#allocation2 + $0x8] sm:$0xff]  ;;  %v361_v12 = vld [vmem:[#allocation7] ss:$0 sm:$0xff]  ;;  %s554_s11 = scalar_lea.vmem %s348_s3, 256  ;;  %p559_p7 = scmp.lt.s32.totalorder %s348_s3, %s348_s3 }
  0x38   :  { %401 = vmatprep.subr.bf16.mxu0 %v590_v0  ;;  %v74_v11 = vpack.c.bf16 %v73_v10, %v72_v9  ;;  %v458_v23 = vld [vmem:[#allocation8 + $0x38] sm:$0xff]   ;;  %v459_v24 = vld [vmem:[#allocation8 + $0x30] sm:$0xff]   ;;  %v460_v25 = vld [vmem:[#allocation8 + $0x28] sm:$0xff]   ;;  %p555_p6 = scmp.ne.s32.totalorder %s348_s3, %s554_s11  ;;  %p560_p8 = scmp.lt.s32.totalorder %s554_s11, %s554_s11 }
  0x39   :  { %420 = vmatpush3.bf16.msra.mxu1 %v458_v23  ;;  %v461_v26 = vld [vmem:[#allocation8 + $0x20] sm:$0xff]   ;;  %v462_v27 = vld [vmem:[#allocation8 + $0x18] sm:$0xff]   ;;  %v463_v28 = vld [vmem:[#allocation8 + $0x10] sm:$0xff]  }
  0x3a   :  { %421 = vmatprep.subr.bf16.mxu1 %v590_v0  ;;  %v464_v29 = vld [vmem:[#allocation8 + $0x8] sm:$0xff]   ;;  %v465_v30 = vld [vmem:[#allocation8] sm:$0xff]   ;;  %v370_v50 = vld [vmem:[#allocation7 + $0x1] ss:$0 sm:$0xff]  ;;  %p561_p9 = por %p560_p8, %p559_p7 }
  0x3b   :  { %402 = vmatpush3.bf16.msra.mxu0 %v451_v2  ;;  %v371_v55 = vld [vmem:[#allocation7 + $0x2] ss:$0 sm:$0xff]  ;;  %v372_v60 = vld [vmem:[#allocation7 + $0x3] ss:$0 sm:$0xff] }
  0x3c   :  { %403 = vmatprep.subr.bf16.mxu0 %v590_v0  ;;  %p562_p10 = pnand %p561_p9, %p555_p6 }
  0x3d   :  { %422 = vmatpush3.bf16.msra.mxu1 %v459_v24 }
  0x3e   :  { %423 = vmatprep.subr.bf16.mxu1 %v590_v0 }
  0x3f   :  { %404 = vmatpush3.bf16.msra.mxu0 %v452_v3 }
  0x40   :  { %405 = vmatprep.subr.bf16.mxu0 %v590_v0 }
  0x41   :  { %424 = vmatpush3.bf16.msra.mxu1 %v460_v25 }
  0x42   :  { %425 = vmatprep.subr.bf16.mxu1 %v590_v0 }
  0x43   :  { %406 = vmatpush3.bf16.msra.mxu0 %v453_v4 }
  0x44   :  { %407 = vmatprep.subr.bf16.mxu0 %v590_v0 }
  0x45   :  { %426 = vmatpush3.bf16.msra.mxu1 %v461_v26 }
  0x46   :  { %427 = vmatprep.subr.bf16.mxu1 %v590_v0 }
  0x47   :  { %408 = vmatpush3.bf16.msra.mxu0 %v454_v5 }
  0x48   :  { %409 = vmatprep.subr.bf16.mxu0 %v590_v0 }
  0x49   :  { %428 = vmatpush3.bf16.msra.mxu1 %v462_v27 }
  0x4a   :  { %429 = vmatprep.subr.bf16.mxu1 %v590_v0 }
  0x4b   :  { %410 = vmatpush3.bf16.msra.mxu0 %v455_v6 }
  0x4c   :  { %411 = vmatprep.subr.bf16.mxu0 %v590_v0 }
  0x4d   :  { %430 = vmatpush3.bf16.msra.mxu1 %v463_v28 }
  0x4e   :  { %431 = vmatprep.subr.bf16.mxu1 %v590_v0 }
  0x4f   :  { %412 = vmatpush3.bf16.msra.mxu0 %v456_v7 }
  0x50   :  { %413 = vmatprep.subr.bf16.mxu0 %v590_v0 }
  0x51   :  { %432 = vmatpush3.bf16.msra.mxu1 %v464_v29 }
  0x52   :  { %433 = vmatprep.subr.bf16.mxu1 %v590_v0 }
  0x53   :  { %414 = vmatpush3.bf16.msra.mxu0 %v457_v8 }
  0x55   :  { %434 = vmatpush3.bf16.msra.mxu1 %v465_v30 }
  0x56   :  { %416 = vmatmul.mubr.bf16.vlgmr.msra.gmra.mxu0 %v74_v11 }
 0x116   :  { %v181_v13 = vpop.f32.mrf.mxu0 }
 0x117   :  { %v182_v14 = vadd.f32 %v361_v12, %v181_v13 }
 0x118   :  { %v417_v15 = vpop.f32.mrf.mxu0 }
 0x119   :  { %466 = vtanh.f32 %v182_v14 }
 0x11a   :  { %v184_v16 = vpop.f32.mrf.mxu0 }
 0x11b   :  { %v185_v17 = vadd.f32 %v361_v12, %v184_v16 }
 0x11c   :  { %v418_v18 = vpop.f32.mrf.mxu0 }
 0x11d   :  { %468 = vtanh.f32 %v185_v17 }
 0x126   :  { %v467_v19 = vpop.eup %466 }
 0x127   :  { %190 = vadd.xlane.f32.xlu0 %v467_v19  ;;  %v196_v20 = vmul.f32 %v467_v19, %v467_v19 }
 0x129   :  { %198 = vadd.xlane.f32.xlu1 %v196_v20 }
 0x12a   :  { %v469_v21 = vpop.eup %468 }
 0x12b   :  { %192 = vadd.xlane.f32.xlu0 %v469_v21  ;;  %v197_v22 = vmul.f32 %v469_v21, %v469_v21 }
 0x12d   :  { %200 = vadd.xlane.f32.xlu1 %v197_v22 }
 0x1b0   :  { %v191_v31 = vpop.xlane.xlu0 %190 }
 0x1b1   :  { %v194_v32 = vmul.f32 0.020833334, %v191_v31 }
 0x1b2   :  { %v199_v33 = vpop.xlane.xlu1 %198 }
 0x1b3   :  { %v204_v34 = vmul.f32 %v194_v32, %v194_v32  ;;  %v202_v35 = vmul.f32 0.020833334, %v199_v33  ;;  %v210_v47 = vsub.f32 %v467_v19, %v194_v32 }
 0x1b4   :  { %v193_v36 = vpop.xlane.xlu0 %192 }
 0x1b5   :  { %v206_v37 = vsub.f32 %v202_v35, %v204_v34  ;;  %v195_v38 = vmul.f32 0.020833334, %v193_v36 }
 0x1b6   :  { %v201_v39 = vpop.xlane.xlu1 %200 }
 0x1b7   :  { %v208_v40 = vmax.f32 %v206_v37, 0.0  ;;  %v205_v41 = vmul.f32 %v195_v38, %v195_v38  ;;  %v203_v42 = vmul.f32 0.020833334, %v201_v39  ;;  %v211_v51 = vsub.f32 %v469_v21, %v195_v38 }
 0x1b9   :  { %v212_v43 = vadd.f32 1e-05, %v208_v40  ;;  %v207_v44 = vsub.f32 %v203_v42, %v205_v41 }
 0x1bb   :  { %470 = vrsqrt.f32 %v212_v43  ;;  %v209_v45 = vmax.f32 %v207_v44, 0.0 }
 0x1bd   :  { %v213_v46 = vadd.f32 1e-05, %v209_v45 }
 0x1bf   :  { %472 = vrsqrt.f32 %v213_v46 }
 0x1c8   :  { %v471_v48 = vpop.eup %470 }
 0x1c9   :  { %v216_v49 = vmul.f32 %v471_v48, %v210_v47 }
 0x1cb   :  { %v222_v54 = vmul.f32 %v370_v50, %v216_v49 }
 0x1cc   :  { %v473_v52 = vpop.eup %472 }
 0x1cd   :  { %v217_v53 = vmul.f32 %v473_v52, %v211_v51  ;;  %v228_v57 = vadd.f32 %v371_v55, %v222_v54 }
 0x1cf   :  { %v223_v56 = vmul.f32 %v370_v50, %v217_v53 }
 0x1d1   :  { %v229_v58 = vadd.f32 %v371_v55, %v223_v56 }
 0x1d3   :  { %v230_v59 = vpack.c.bf16 %v229_v58, %v228_v57 }
 0x1d5   :  { %436 = vmatmul.mubr.bf16.vlgmr.msra.gmra.mxu1 %v230_v59 }
 0x295   :  { %v333_v61 = vpop.f32.mrf.mxu1 }
 0x296   :  { %v334_v62 = vadd.f32 %v372_v60, %v333_v61 }
 0x297   :  { %v437_v63 = vpop.f32.mrf.mxu1 }
 0x298   :  { %340 = vst [vmem:[#allocation10] sm:$0xff] %v334_v62 }
 0x299   :  { %v336_v0 = vpop.f32.mrf.mxu1 }
 0x29a   :  { %v337_v1 = vadd.f32 %v372_v60, %v336_v0 }
 0x29b   :  { %v438_v2 = vpop.f32.mrf.mxu1 }
 0x29c   :  { %341 = vst [vmem:[#allocation10 + $0x8] sm:$0xff] %v337_v1 }
 0x29d   :  { %565 = shalt.err (!%p562_p10)
}
 0x29e   :  { %353 = dma.vmem_to_hbm [thread:$0]  %s348_s3, 256, %s667_s4, [#allocation4], %s586_s25, %s586_s25, %s587_s26  }
 0x29f   :  { %580 = dma.done.wait [#allocation4], 256  }
 0x2a0   :  { %581 = vsyncadd [#allocation4], 4294967040 }
 0x2a1   :  { %357 = vsyncpa [#allocation3], 1 }
 0x2a2   :  { %358 = vsyncpa [#allocation6], 1 }
 0x2a3   :  { %359 = vsyncpa [#allocation9], 1 }
 0x2a4   :  { %360 = vsyncpa [#allocation4], 1 }

</bundles_post_ra>
